<compile_context>
chip_gen: v5e
topology: v5e:2x2
jax: 0.10.0
libtpu: 0.0.40
codegen_flags: <defaults>
</compile_context>

<pallas_src>
import numpy as np
import jax
import jax.numpy as jnp
from jax.experimental import pallas as pl
from jax.experimental.pallas import tpu as pltpu


# ---------------------------------------------------------------------------
# Module hyper-parameters (args used by AutoEncoder.__init__)
# ---------------------------------------------------------------------------
class Args:
    num_latent = 3
    num_trash = 2
    depth = 4


# =========================== parameter-setup glue ===========================
def _rx(theta):
    """2x2 complex RX(theta)."""
    c = jnp.cos(theta / 2).astype(jnp.complex64)
    s = (-1j) * jnp.sin(theta / 2).astype(jnp.complex64)
    return jnp.stack([jnp.stack([c, s]), jnp.stack([s, c])])


def _cnot_unitary(control, target, n):
    """CNOT permutation matrix on n qubits (wire 0 = most significant bit)."""
    k = np.arange(2 ** n)
    cbit = (k >> (n - 1 - control)) & 1
    perm = k ^ (cbit << (n - 1 - target))
    U = np.zeros((2 ** n, 2 ** n), dtype=np.complex64)
    U[perm, k] = 1.0
    return jnp.asarray(U)


def _folded_entangler_unitary(weights_2d):
    """Product of all qml.BasicEntanglerLayers layer unitaries (RX per wire + CNOT ring).

    Layers are data-independent, so folding them here removes depth matmuls per batch
    from the kernel.  Returns U_total = U_{depth-1} @ ... @ U_0, shape (2**n, 2**n) complex64.
    """
    depth, n = weights_2d.shape
    dim = 2 ** n
    if n == 1:
        ring = jnp.eye(dim, dtype=jnp.complex64)
    elif n == 2:
        ring = _cnot_unitary(0, 1, n)          # two-wire ring uses a single CNOT
    else:
        ring = jnp.eye(dim, dtype=jnp.complex64)
        for j in range(n):
            ring = _cnot_unitary(j, (j + 1) % n, n) @ ring
    total = jnp.eye(dim, dtype=jnp.complex64)
    for l in range(depth):
        rx = _rx(weights_2d[l, 0])
        for j in range(1, n):
            rx = jnp.kron(rx, _rx(weights_2d[l, j]))
        total = (ring @ rx) @ total            # layer l acts after layers 0..l-1
    return total


# ================================ Pallas kernel ==============================
def _qae_kernel(feat_ref, w_ref, out_ref):
    """One batch tile: feats (n_qubits, TB) f32, W (2R, D) f32 -> out (1, TB) f32."""
    n_qubits = feat_ref.shape[0]
    D = 1 << n_qubits

    # ---- RX AngleEmbedding magnitudes (phase diag already folded into W) ----
    half = feat_ref[...] * 0.5                                 # theta / 2, (n_qubits, TB)
    c = jnp.cos(half)                                          # EUP (free slot)
    s = jnp.sin(half)

    # per-row bit masks are (D, 1): no full-width integer/select-chain work
    kcol = jax.lax.broadcasted_iota(jnp.int32, (D, 1), 0)      # basis index per sublane row
    mag = None
    for j in range(n_qubits):                                  # static unroll
        bit = (kcol >> (n_qubits - 1 - j)) & 1                 # wire j -> MSB-first bit, (D, 1)
        f = jnp.where(bit == 0, c[j:j + 1, :], s[j:j + 1, :])  # (D, TB)
        mag = f if mag is None else mag * f                    # (D, TB) real amplitudes

    # ---- folded (entangler @ phase) restricted to trash==0 rows: one f32 MXU dot ----
    psi = jnp.dot(w_ref[...], mag, preferred_element_type=jnp.float32)   # (2R, TB)

    # ---- SWAP test: P(aux=1) = (1 - P(all trash qubits == |0>)) / 2 ----
    p_trash0 = jnp.sum(psi * psi, axis=0, keepdims=True)       # (1, TB)
    out_ref[...] = 0.5 * (1.0 - p_trash0)


# ================================= wrapper ==================================
def _round_up(x, m):
    return ((x + m - 1) // m) * m


def quantum_autoencoder_forward(features, weights, args, *, max_batch_tile=1024):
    """AutoEncoder.forward: returns probs(aux)[:, 1] as float32, shape (batch,)."""
    n_qubits = args.num_latent + args.num_trash
    D = 1 << n_qubits
    R = 1 << args.num_latent                                  # rows surviving the trash projector

    feats = features[:, :n_qubits].astype(jnp.float32)        # features[:, :latent+trash]
    B = feats.shape[0]

    # Lane tile: always a multiple of 128; large for per-step-overhead amortization, but keep
    # >= 2 grid steps whenever there is enough batch (uses both TensorCores on v7x).
    max_tile = max(128, (int(max_batch_tile) // 128) * 128)
    b128 = _round_up(max(B, 1), 128)
    TB = min(max_tile, b128)
    if b128 // TB < 2 and b128 >= 256:
        TB = max(128, _round_up(b128 // 2, 128))
    B_pad = _round_up(B, TB)
    feats_t = jnp.pad(feats.T, ((0, 0), (0, B_pad - B)))      # (n_qubits, B_pad), batch in lanes

    # ---- fold entangler layers + embedding phase + trash projector into one f32 matrix ----
    w2d = weights.reshape(args.depth, n_qubits)               # weights.reshape(-1, n_qubits)
    U = _folded_entangler_unitary(w2d)                        # (D, D) complex64
    k = np.arange(D)
    pop = np.array([bin(int(x)).count("1") for x in k], dtype=np.int64)
    phase = np.power(-1j, pop).astype(np.complex64)           # (-i)^popcount(k), embedding phase
    Uphase = U * jnp.asarray(phase)[None, :]                  # U @ diag(phase)
    rows = np.nonzero((k & ((1 << args.num_trash) - 1)) == 0)[0]   # basis states: trash bits == 0
    Up = Uphase[jnp.asarray(rows), :]                          # (R, D) complex
    W = jnp.concatenate([jnp.real(Up), jnp.imag(Up)], axis=0).astype(jnp.float32)   # (2R, D)

    out = pl.pallas_call(
        _qae_kernel,
        out_shape=jax.ShapeDtypeStruct((1, B_pad), jnp.float32),
        grid=(B_pad // TB,),
        in_specs=[
            pl.BlockSpec((n_qubits, TB), lambda i: (0, i)),   # batch-tiled features
            pl.BlockSpec((2 * R, D), lambda i: (0, 0)),       # constant -> stays resident
        ],
        out_specs=pl.BlockSpec((1, TB), lambda i: (0, i)),    # lane-dense output slab
        compiler_params=pltpu.CompilerParams(
            dimension_semantics=("parallel",)),               # megacore on v7x
    )(feats_t, W)
    return out[0, :B]


# ========================= pure-numpy reference sim =========================
def _reference_forward(features, weights, args):
    """Full statevector simulation of the whole circuit (incl. aux + reference reg)."""
    n_q = args.num_latent + args.num_trash
    total = args.num_latent + 2 * args.num_trash + 1
    aux = total - 1
    feats = np.asarray(features, dtype=np.float64)[:, :n_q]
    w = np.asarray(weights, dtype=np.float64).reshape(args.depth, n_q)

    def rx(t):
        c, s = np.cos(t / 2), np.sin(t / 2)
        return np.array([[c, -1j * s], [-1j * s, c]], dtype=np.complex128)

    H = np.array([[1, 1], [1, -1]], dtype=np.complex128) / np.sqrt(2.0)
    CNOT = np.eye(4, dtype=np.complex128)[[0, 1, 3, 2]]
    CSWAP = np.eye(8, dtype=np.complex128)[[0, 1, 2, 3, 4, 6, 5, 7]]

    def apply(state, gate, wires):
        m = len(wires)
        st = np.moveaxis(state, wires, list(range(m)))
        shp = st.shape
        st = gate @ st.reshape(2 ** m, -1)
        return np.moveaxis(st.reshape(shp), list(range(m)), wires)

    outs = []
    for b in range(feats.shape[0]):
        st = np.zeros((2,) * total, dtype=np.complex128)
        st[(0,) * total] = 1.0
        for j in range(n_q):
            st = apply(st, rx(feats[b, j]), [j])
        for l in range(args.depth):
            for j in range(n_q):
                st = apply(st, rx(w[l, j]), [j])
            if n_q == 2:
                st = apply(st, CNOT, [0, 1])
            elif n_q > 2:
                for j in range(n_q):
                    st = apply(st, CNOT, [j, (j + 1) % n_q])
        st = apply(st, H, [aux])
        for i in range(args.num_trash):
            st = apply(st, CSWAP,
                       [aux, args.num_latent + i, args.num_latent + args.num_trash + i])
        st = apply(st, H, [aux])
        probs = np.abs(st) ** 2
        outs.append(np.moveaxis(probs, aux, 0)[1].sum())
    return np.array(outs, dtype=np.float32)


# ==================================== main ==================================
if __name__ == "__main__":
    args = Args()
    n_qubits = args.num_latent + args.num_trash

    key = jax.random.PRNGKey(0)
    kf, kw = jax.random.split(key)
    B, F = 4, 8
    features = jax.random.uniform(kf, (B, F), dtype=jnp.float32,
                                  minval=0.0, maxval=float(np.pi))
    # deterministic stand-in for nn.Parameter(0.01 * torch.rand(depth * n_qubits))
    weights = 0.01 * jax.random.uniform(kw, (args.depth * n_qubits,),
                                        dtype=jnp.float32)

    out = quantum_autoencoder_forward(features, weights, args)
    out = jax.block_until_ready(out)

    ref = _reference_forward(features, weights, args)
    assert out.shape == (B,) and out.dtype == jnp.float32
    if not np.allclose(np.asarray(out), ref, atol=1e-3, rtol=1e-3):
        raise AssertionError(f"mismatch: kernel={np.asarray(out)} ref={ref}")
    print("KERNEL_OK")
</pallas_src>

<mosaic_0001>
module attributes {stable_mosaic.version = 11 : i64} {
  func.func @_qae_kernel(%arg0: i32, %arg1: memref<5x128xf32, #tpu.memory_space<vmem>>, %arg2: memref<16x32xf32, #tpu.memory_space<vmem>>, %arg3: memref<1x128xf32, #tpu.memory_space<vmem>>) attributes {dimension_semantics = [#tpu.dimension_semantics<parallel>], iteration_bounds = array<i64: 1>, scalar_prefetch = 0 : i64, scratch_operands = 0 : i64, tpu.core_type = #tpu.core_type<tc>, window_params = [{transform_indices = @transform_0, window_bounds = array<i64: 5, 128>}, {pipeline_mode = #tpu.pipeline_mode<synchronous>, transform_indices = @transform_1, window_bounds = array<i64: 16, 32>}, {transform_indices = @transform_2, window_bounds = array<i64: 1, 128>}]} {
    %c0 = arith.constant 0 : index
    %c0_0 = arith.constant 0 : index
    %0 = vector.load %arg1[%c0, %c0_0] : memref<5x128xf32, #tpu.memory_space<vmem>>, vector<5x128xf32>
    %cst = arith.constant 5.000000e-01 : f32
    %1 = vector.broadcast %cst : f32 to vector<5x128xf32>
    %2 = arith.mulf %0, %1 : vector<5x128xf32>
    %3 = math.cos %2 : vector<5x128xf32>
    %4 = math.sin %2 : vector<5x128xf32>
    %5 = tpu.iota {dimensions = array<i32: 0>} : vector<32x1xi32>
    %c4_i32 = arith.constant 4 : i32
    %6 = vector.broadcast %c4_i32 : i32 to vector<32x1xi32>
    %7 = arith.shrsi %5, %6 : vector<32x1xi32>
    %c1_i32 = arith.constant 1 : i32
    %8 = vector.broadcast %c1_i32 : i32 to vector<32x1xi32>
    %9 = arith.andi %7, %8 : vector<32x1xi32>
    %c0_i32 = arith.constant 0 : i32
    %10 = vector.broadcast %c0_i32 : i32 to vector<32x1xi32>
    %11 = arith.cmpi eq, %9, %10 : vector<32x1xi32>
    %12 = vector.extract_strided_slice %3 {offsets = [0, 0], sizes = [1, 128], strides = [1, 1]} : vector<5x128xf32> to vector<1x128xf32>
    %13 = vector.extract_strided_slice %4 {offsets = [0, 0], sizes = [1, 128], strides = [1, 1]} : vector<5x128xf32> to vector<1x128xf32>
    %14 = vector.shape_cast %11 : vector<32x1xi1> to vector<32x1xi1>
    %15 = vector.broadcast %14 : vector<32x1xi1> to vector<32x128xi1>
    %16 = vector.shape_cast %12 : vector<1x128xf32> to vector<1x128xf32>
    %17 = vector.broadcast %16 : vector<1x128xf32> to vector<32x128xf32>
    %18 = vector.shape_cast %13 : vector<1x128xf32> to vector<1x128xf32>
    %19 = vector.broadcast %18 : vector<1x128xf32> to vector<32x128xf32>
    %20 = arith.select %15, %17, %19 : vector<32x128xi1>, vector<32x128xf32>
    %c3_i32 = arith.constant 3 : i32
    %21 = vector.broadcast %c3_i32 : i32 to vector<32x1xi32>
    %22 = arith.shrsi %5, %21 : vector<32x1xi32>
    %c1_i32_1 = arith.constant 1 : i32
    %23 = vector.broadcast %c1_i32_1 : i32 to vector<32x1xi32>
    %24 = arith.andi %22, %23 : vector<32x1xi32>
    %c0_i32_2 = arith.constant 0 : i32
    %25 = vector.broadcast %c0_i32_2 : i32 to vector<32x1xi32>
    %26 = arith.cmpi eq, %24, %25 : vector<32x1xi32>
    %27 = vector.extract_strided_slice %3 {offsets = [1, 0], sizes = [1, 128], strides = [1, 1]} : vector<5x128xf32> to vector<1x128xf32>
    %28 = vector.extract_strided_slice %4 {offsets = [1, 0], sizes = [1, 128], strides = [1, 1]} : vector<5x128xf32> to vector<1x128xf32>
    %29 = vector.shape_cast %26 : vector<32x1xi1> to vector<32x1xi1>
    %30 = vector.broadcast %29 : vector<32x1xi1> to vector<32x128xi1>
    %31 = vector.shape_cast %27 : vector<1x128xf32> to vector<1x128xf32>
    %32 = vector.broadcast %31 : vector<1x128xf32> to vector<32x128xf32>
    %33 = vector.shape_cast %28 : vector<1x128xf32> to vector<1x128xf32>
    %34 = vector.broadcast %33 : vector<1x128xf32> to vector<32x128xf32>
    %35 = arith.select %30, %32, %34 : vector<32x128xi1>, vector<32x128xf32>
    %36 = arith.mulf %20, %35 : vector<32x128xf32>
    %c2_i32 = arith.constant 2 : i32
    %37 = vector.broadcast %c2_i32 : i32 to vector<32x1xi32>
    %38 = arith.shrsi %5, %37 : vector<32x1xi32>
    %c1_i32_3 = arith.constant 1 : i32
    %39 = vector.broadcast %c1_i32_3 : i32 to vector<32x1xi32>
    %40 = arith.andi %38, %39 : vector<32x1xi32>
    %c0_i32_4 = arith.constant 0 : i32
    %41 = vector.broadcast %c0_i32_4 : i32 to vector<32x1xi32>
    %42 = arith.cmpi eq, %40, %41 : vector<32x1xi32>
    %43 = vector.extract_strided_slice %3 {offsets = [2, 0], sizes = [1, 128], strides = [1, 1]} : vector<5x128xf32> to vector<1x128xf32>
    %44 = vector.extract_strided_slice %4 {offsets = [2, 0], sizes = [1, 128], strides = [1, 1]} : vector<5x128xf32> to vector<1x128xf32>
    %45 = vector.shape_cast %42 : vector<32x1xi1> to vector<32x1xi1>
    %46 = vector.broadcast %45 : vector<32x1xi1> to vector<32x128xi1>
    %47 = vector.shape_cast %43 : vector<1x128xf32> to vector<1x128xf32>
    %48 = vector.broadcast %47 : vector<1x128xf32> to vector<32x128xf32>
    %49 = vector.shape_cast %44 : vector<1x128xf32> to vector<1x128xf32>
    %50 = vector.broadcast %49 : vector<1x128xf32> to vector<32x128xf32>
    %51 = arith.select %46, %48, %50 : vector<32x128xi1>, vector<32x128xf32>
    %52 = arith.mulf %36, %51 : vector<32x128xf32>
    %c1_i32_5 = arith.constant 1 : i32
    %53 = vector.broadcast %c1_i32_5 : i32 to vector<32x1xi32>
    %54 = arith.shrsi %5, %53 : vector<32x1xi32>
    %c1_i32_6 = arith.constant 1 : i32
    %55 = vector.broadcast %c1_i32_6 : i32 to vector<32x1xi32>
    %56 = arith.andi %54, %55 : vector<32x1xi32>
    %c0_i32_7 = arith.constant 0 : i32
    %57 = vector.broadcast %c0_i32_7 : i32 to vector<32x1xi32>
    %58 = arith.cmpi eq, %56, %57 : vector<32x1xi32>
    %59 = vector.extract_strided_slice %3 {offsets = [3, 0], sizes = [1, 128], strides = [1, 1]} : vector<5x128xf32> to vector<1x128xf32>
    %60 = vector.extract_strided_slice %4 {offsets = [3, 0], sizes = [1, 128], strides = [1, 1]} : vector<5x128xf32> to vector<1x128xf32>
    %61 = vector.shape_cast %58 : vector<32x1xi1> to vector<32x1xi1>
    %62 = vector.broadcast %61 : vector<32x1xi1> to vector<32x128xi1>
    %63 = vector.shape_cast %59 : vector<1x128xf32> to vector<1x128xf32>
    %64 = vector.broadcast %63 : vector<1x128xf32> to vector<32x128xf32>
    %65 = vector.shape_cast %60 : vector<1x128xf32> to vector<1x128xf32>
    %66 = vector.broadcast %65 : vector<1x128xf32> to vector<32x128xf32>
    %67 = arith.select %62, %64, %66 : vector<32x128xi1>, vector<32x128xf32>
    %68 = arith.mulf %52, %67 : vector<32x128xf32>
    %c0_i32_8 = arith.constant 0 : i32
    %69 = vector.broadcast %c0_i32_8 : i32 to vector<32x1xi32>
    %70 = arith.shrsi %5, %69 : vector<32x1xi32>
    %c1_i32_9 = arith.constant 1 : i32
    %71 = vector.broadcast %c1_i32_9 : i32 to vector<32x1xi32>
    %72 = arith.andi %70, %71 : vector<32x1xi32>
    %c0_i32_10 = arith.constant 0 : i32
    %73 = vector.broadcast %c0_i32_10 : i32 to vector<32x1xi32>
    %74 = arith.cmpi eq, %72, %73 : vector<32x1xi32>
    %75 = vector.extract_strided_slice %3 {offsets = [4, 0], sizes = [1, 128], strides = [1, 1]} : vector<5x128xf32> to vector<1x128xf32>
    %76 = vector.extract_strided_slice %4 {offsets = [4, 0], sizes = [1, 128], strides = [1, 1]} : vector<5x128xf32> to vector<1x128xf32>
    %77 = vector.shape_cast %74 : vector<32x1xi1> to vector<32x1xi1>
    %78 = vector.broadcast %77 : vector<32x1xi1> to vector<32x128xi1>
    %79 = vector.shape_cast %75 : vector<1x128xf32> to vector<1x128xf32>
    %80 = vector.broadcast %79 : vector<1x128xf32> to vector<32x128xf32>
    %81 = vector.shape_cast %76 : vector<1x128xf32> to vector<1x128xf32>
    %82 = vector.broadcast %81 : vector<1x128xf32> to vector<32x128xf32>
    %83 = arith.select %78, %80, %82 : vector<32x128xi1>, vector<32x128xf32>
    %84 = arith.mulf %68, %83 : vector<32x128xf32>
    %c0_11 = arith.constant 0 : index
    %c0_12 = arith.constant 0 : index
    %85 = vector.load %arg2[%c0_11, %c0_12] : memref<16x32xf32, #tpu.memory_space<vmem>>, vector<16x32xf32>
    %cst_13 = arith.constant dense<0.000000e+00> : vector<16x128xf32>
    %86 = tpu.matmul %85, %84, %cst_13 {dimension_numbers = #tpu.dot_dimension_numbers<[1], [0], [0], [1], [0, 0, 1, 1], [], []>} : vector<16x32xf32>, vector<32x128xf32>, vector<16x128xf32> -> vector<16x128xf32>
    %87 = arith.mulf %86, %86 : vector<16x128xf32>
    %cst_14 = arith.constant dense<0.000000e+00> : vector<128xf32>
    %88 = vector.multi_reduction <add>, %87, %cst_14 [0] : vector<16x128xf32> to vector<128xf32>
    %89 = vector.shape_cast %88 : vector<128xf32> to vector<1x128xf32>
    %cst_15 = arith.constant 1.000000e+00 : f32
    %90 = vector.broadcast %cst_15 : f32 to vector<1x128xf32>
    %91 = arith.subf %90, %89 : vector<1x128xf32>
    %cst_16 = arith.constant 5.000000e-01 : f32
    %92 = vector.broadcast %cst_16 : f32 to vector<1x128xf32>
    %93 = arith.mulf %92, %91 : vector<1x128xf32>
    %c0_17 = arith.constant 0 : index
    %c0_18 = arith.constant 0 : index
    %94 = vector.load %arg3[%c0_17, %c0_18] : memref<1x128xf32, #tpu.memory_space<vmem>>, vector<1x128xf32>
    tpu.vector_store %arg3[%c0_17, %c0_18], %93 {strides = array<i32>} : memref<1x128xf32, #tpu.memory_space<vmem>>, vector<1x128xf32>,
    return
  }
  func.func @transform_0(%arg0: i32) -> (i32, i32) {
    %c0_i32 = arith.constant 0 : i32
    %c0_i32_0 = arith.constant 0 : i32
    return %c0_i32, %arg0 : i32, i32
  }
  func.func @transform_1(%arg0: i32) -> (i32, i32) {
    %c0_i32 = arith.constant 0 : i32
    %c0_i32_0 = arith.constant 0 : i32
    %c0_i32_1 = arith.constant 0 : i32
    return %c0_i32, %c0_i32_0 : i32, i32
  }
  func.func @transform_2(%arg0: i32) -> (i32, i32) {
    %c0_i32 = arith.constant 0 : i32
    %c0_i32_0 = arith.constant 0 : i32
    return %c0_i32, %arg0 : i32, i32
  }
}

</mosaic_0001>

<bundles_post_ra>
// kernel: tpu_custom_call.1
= control target key start
LH: loop header
LB: loop body
LE: loop exit
PB: predicated region body
PF: predicated region fallthrough
CT: control target
= control target key end

     0   :  { %7 = vsyncpa [#allocation3], 0  ;;  %s887_s0 = inlined_call_operand.hbm [shape: f32[5,128], index: 0, kind: input, shape index: {}]   ;;  %s888_s1 = inlined_call_operand.hbm [shape: f32[16,32], index: 1, kind: input, shape index: {}]   ;;  %s889_s2 = inlined_call_operand.hbm [shape: f32[1,128], index: 2, kind: output, shape index: {}]  }
   0x1   :  { %8 = vsyncpa [#allocation6], 0 }
   0x2   :  { %9 = vsyncpa [#allocation4], 0  ;;  %s15_s11 = sshll.u32 %s887_s0, 4  ;;  %s664_s12 = smov [#allocation2]   ;;  %s16_s11 = int_to_ptr.hbm [resolvable:$true] %s15_s11 }
   0x3   :  { %s17_s13 = sshll.u32 %s664_s12, 4  ;;  %s25_s16 = sshll.u32 %s888_s1, 4  ;;  %s18_s13 = int_to_ptr.vmem [resolvable:$true] %s17_s13  ;;  %s26_s16 = int_to_ptr.hbm [resolvable:$true] %s25_s16 }
   0x4   :  { %20 = dma.hbm_to_vmem [thread:$0]  %s16_s11, 128, %s18_s13, [#allocation3]  }
   0x5   :  { %s665_s17 = smov [#allocation5]   ;;  %s666_s19 = smov 128  }
   0x6   :  { %s27_s18 = sshll.u32 %s665_s17, 4  ;;  %s667_s20 = smov 8   ;;  %s28_s18 = int_to_ptr.vmem [resolvable:$true] %s27_s18 }
   0x7   :  { %33 = dma.hbm_to_vmem [thread:$0]  %s26_s16, 256, %s28_s18, [#allocation6], %s666_s19, %s666_s19, %s667_s20  }
   0x8   :  { %658 = dma.done.wait [#allocation3], 128  }
   0x9   :  { %659 = vsyncadd [#allocation3], 4294967168 }
   0xa   :  { %660 = dma.done.wait [#allocation6], 256  }
   0xb   :  { %661 = vsyncadd [#allocation6], 4294967040  ;;  %v42_v0 = vld [vmem:[#allocation2] sm:$0x1f]  ;;  %v668_v13 = vmov 683565275  }
   0xc   :  { %v697_v1 = vmul.f32 0.5, %v42_v0  ;;  %v669_v15 = vmov 2475754826   ;;  %v670_v17 = vmov 2131351028   ;;  %s675_s0 = smov [#allocation7]  }
   0xd   :  { %v671_v19 = vmov 2102212464   ;;  %v672_v21 = vmov 920167782   ;;  %v673_v27 = vmov 1326507024  }
   0xe   :  { %v47_v2 = vand.u32 2139095040, %v697_v1  ;;  %v44_v4 = vand.u32 2147483647, %v697_v1  ;;  %vm46_vm12 = vcmp.lt.s32.totalorder %v697_v1, 0  ;;  %s549_s1 = sshll.u32 %s675_s0, 4  ;;  %s551_s23 = sshll.u32 %s889_s2, 4  ;;  %s550_s1 = int_to_ptr.vmem [resolvable:$true] %s549_s1  ;;  %s552_s23 = int_to_ptr.hbm [resolvable:$true] %s551_s23 }
  0x10   :  { %v48_v3 = vshrl.u32 %v47_v2, 23  ;;  %v51_v7 = vand.u32 8388607, %v44_v4  ;;  %v674_v2 = vmov 0   ;;  %vm45_vm13 = vcmp.le.f32.partialorder %v44_v4, 0.7853982 }
  0x12   :  { %v562_v5 = vadd.s32 4294967169, %v48_v3  ;;  %v52_v10 = vor.u32 8388608, %v51_v7 }
  0x14   :  { %v54_v6 = vadd.s32 1, %v562_v5  ;;  %v706_v29 = vshll.u32 %v52_v10, 8 }
  0x16   :  { %vm55_vm0 = vcmp.gt.s32.totalorder %v54_v6, 0  ;;  %v93_v41 = vand.u32 65535, %v706_v29  ;;  %v94_v42 = vshrl.u32 %v706_v29, 16 }
  0x17   :  { %v56_v8 = vsel %vm55_vm0, %v54_v6, 0  ;;  %vm187_vm0 = vweird.f32 %v697_v1 }
  0x18   :  { %v58_v9 = vand.u32 31, %v56_v8  ;;  %v703_v11 = vshrl.u32 %v56_v8, 5 }
  0x1a   :  { %v59_v12 = vsub.s32 32, %v58_v9  ;;  %v61_v14 = vshll.u32 %v668_v13, %v58_v9  ;;  %v64_v16 = vshll.u32 %v669_v15, %v58_v9  ;;  %v67_v18 = vshll.u32 %v670_v17, %v58_v9 }
  0x1b   :  { %v70_v20 = vshll.u32 %v671_v19, %v58_v9  ;;  %v73_v22 = vshll.u32 %v672_v21, %v58_v9  ;;  %vm76_vm1 = vcmp.lt.s32.totalorder %v703_v11, 1  ;;  %vm79_vm2 = vcmp.lt.s32.totalorder %v703_v11, 4 }
  0x1c   :  { %v62_v23 = vshrl.u32 %v669_v15, %v59_v12  ;;  %v65_v24 = vshrl.u32 %v670_v17, %v59_v12  ;;  %v68_v25 = vshrl.u32 %v671_v19, %v59_v12  ;;  %v71_v26 = vshrl.u32 %v672_v21, %v59_v12 }
  0x1d   :  { %v74_v28 = vshrl.u32 %v673_v27, %v59_v12  ;;  %vm78_vm3 = vcmp.lt.s32.totalorder %v703_v11, 3  ;;  %vm77_vm4 = vcmp.lt.s32.totalorder %v703_v11, 2  ;;  %v60_v49 = vshrl.u32 %v668_v13, %v59_v12 }
  0x1e   :  { %v63_v30 = vor.u32 %v62_v23, %v61_v14  ;;  %v66_v31 = vor.u32 %v65_v24, %v64_v16  ;;  %v69_v32 = vor.u32 %v68_v25, %v67_v18  ;;  %v72_v33 = vor.u32 %v71_v26, %v70_v20 }
  0x1f   :  { %v75_v34 = vor.u32 %v74_v28, %v73_v22 }
  0x20   :  { %v84_v35 = vsel %vm76_vm1, %v63_v30, %v66_v31  ;;  %v88_v36 = vsel %vm76_vm1, %v66_v31, %v69_v32  ;;  %v85_v37 = vsel %vm79_vm2, %v72_v33, 920167782  ;;  %v80_v62 = vsel %vm76_vm1, %v60_v49, %v63_v30 }
  0x21   :  { %v89_v38 = vsel %vm79_vm2, %v75_v34, 1326507024  ;;  %v86_v39 = vsel %vm78_vm3, %v69_v32, %v85_v37  ;;  %v81_v0 = vsel %vm79_vm2, %v69_v32, 2102212464 }
  0x22   :  { %v90_v40 = vsel %vm78_vm3, %v72_v33, %v89_v38  ;;  %v87_v43 = vsel %vm77_vm4, %v84_v35, %v86_v39  ;;  %v82_v13 = vsel %vm78_vm3, %v66_v31, %v81_v0 }
  0x23   :  { %v91_v44 = vsel %vm77_vm4, %v88_v36, %v90_v40  ;;  %v117_v47 = vand.u32 65535, %v87_v43  ;;  %v118_v48 = vshrl.u32 %v87_v43, 16  ;;  %v83_v21 = vsel %vm77_vm4, %v80_v62, %v82_v13 }
  0x24   :  { %v95_v45 = vand.u32 65535, %v91_v44  ;;  %v96_v46 = vshrl.u32 %v91_v44, 16  ;;  %v137_v25 = vmul.u32 %v706_v29, %v83_v21 }
  0x25   :  { %v119_v53 = vmul.u32 %v117_v47, %v93_v41  ;;  %v120_v54 = vmul.u32 %v118_v48, %v93_v41  ;;  %v121_v55 = vmul.u32 %v117_v47, %v94_v42  ;;  %v122_v59 = vmul.u32 %v118_v48, %v94_v42 }
  0x26   :  { %v97_v50 = vmul.u32 %v95_v45, %v93_v41  ;;  %v98_v51 = vmul.u32 %v96_v46, %v93_v41  ;;  %v99_v52 = vmul.u32 %v95_v45, %v94_v42  ;;  %v100_v56 = vmul.u32 %v96_v46, %v94_v42 }
  0x27   :  { %v123_v60 = vshll.u32 %v120_v54, 16  ;;  %v125_v61 = vshll.u32 %v121_v55, 16  ;;  %v124_v10 = vshrl.u32 %v120_v54, 16  ;;  %v126_v17 = vshrl.u32 %v121_v55, 16 }
  0x28   :  { %v101_v57 = vshll.u32 %v98_v51, 16  ;;  %v103_v58 = vshll.u32 %v99_v52, 16  ;;  %v102_v6 = vshrl.u32 %v98_v51, 16  ;;  %v104_v14 = vshrl.u32 %v99_v52, 16 }
  0x29   :  { %vm127_vm6 = vc.u32 %v119_v53, %v123_v60  ;;  %v129_v5 = vadd.s32 %v123_v60, %v119_v53  ;;  %v353_v47 = vlaneseq }
  0x2a   :  { %vm105_vm5 = vc.u32 %v97_v50, %v101_v57  ;;  %v107_v63 = vadd.s32 %v101_v57, %v97_v50  ;;  %v128_v8 = vsel %vm127_vm6, 1, %v674_v2 }
  0x2b   :  { %v106_v3 = vsel %vm105_vm5, 1, %v674_v2  ;;  %v130_v12 = vadd.s32 %v128_v8, %v122_v59  ;;  %vm131_vm8 = vc.u32 %v129_v5, %v125_v61  ;;  %v133_v20 = vadd.s32 %v129_v5, %v125_v61 }
  0x2c   :  { %v108_v7 = vadd.s32 %v106_v3, %v100_v56  ;;  %vm109_vm7 = vc.u32 %v107_v63, %v103_v58  ;;  %v132_v16 = vsel %vm131_vm8, 1, %v674_v2  ;;  %v739_v51 = vshrl.u32 %v353_v47, 7 }
  0x2d   :  { %v110_v9 = vsel %vm109_vm7, 1, %v674_v2  ;;  %v134_v18 = vadd.s32 %v132_v16, %v130_v12 }
  0x2e   :  { %v112_v15 = vadd.s32 %v110_v9, %v108_v7  ;;  %v745_v57 = vadd.s32 24, %v739_v51  ;;  %v748_v58 = vadd.s32 16, %v739_v51  ;;  %v759_v9 = vadd.s32 8, %v739_v51 }
  0x2f   :  { %v135_v22 = vadd.s32 %v134_v18, %v124_v10 }
  0x30   :  { %v113_v19 = vadd.s32 %v112_v15, %v102_v6  ;;  %v361_v4 = vshra.s32 %v745_v57, 4  ;;  %v387_v0 = vshra.s32 %v745_v57, 3  ;;  %v417_v2 = vshra.s32 %v745_v57, 2 }
  0x31   :  { %v136_v24 = vadd.s32 %v135_v22, %v126_v17  ;;  %v360_v3 = vshra.s32 %v748_v58, 4  ;;  %v447_v7 = vshra.s32 %v745_v57, 1  ;;  %v386_v8 = vshra.s32 %v748_v58, 3 }
  0x32   :  { %v114_v23 = vadd.s32 %v113_v19, %v104_v14  ;;  %v416_v14 = vshra.s32 %v748_v58, 2  ;;  %v765_v15 = vand.u32 1, %v361_v4  ;;  %v767_v16 = vand.u32 1, %v387_v0 }
  0x33   :  { %v140_v26 = vadd.s32 1, %v136_v24  ;;  %v769_v17 = vand.u32 1, %v417_v2  ;;  %v771_v18 = vand.u32 1, %v360_v3  ;;  %v774_v21 = vand.u32 1, %v447_v7 }
  0x34   :  { %vm139_vm9 = vc.u32 %v114_v23, %v133_v20  ;;  %v138_v11 = vadd.s32 %v133_v20, %v114_v23  ;;  %v776_v22 = vand.u32 1, %v386_v8  ;;  %v446_v23 = vshra.s32 %v748_v58, 1 }
  0x35   :  { %v141_v27 = vsel %vm139_vm9, %v140_v26, %v136_v24  ;;  %v359_v24 = vshra.s32 %v759_v9, 4  ;;  %v415_v26 = vshra.s32 %v759_v9, 2  ;;  %vm369_vm5 = vcmp.eq.s32.totalorder %v765_v15, 0 }
  0x36   :  { %v142_v28 = vadd.s32 %v141_v27, %v137_v25  ;;  %v385_v25 = vshra.s32 %v759_v9, 3  ;;  %vm395_vm6 = vcmp.eq.s32.totalorder %v767_v16, 0  ;;  %vm425_vm7 = vcmp.eq.s32.totalorder %v769_v17, 0 }
  0x37   :  { %vm368_vm8 = vcmp.eq.s32.totalorder %v771_v18, 0 }
  0x38   :  { %v143_v30 = vadd.s32 536870912, %v142_v28 }
  0x3a   :  { %v144_v31 = vshrl.u32 %v143_v30, 30  ;;  %v783_v30 = vand.u32 1, %v416_v14 }
  0x3c   :  { %v145_v32 = vshll.u32 %v144_v31, 30  ;;  %v168_v49 = vsub.s32 4, %v144_v31 }
  0x3e   :  { %v146_v33 = vsub.s32 %v142_v28, %v145_v32  ;;  %v169_v53 = vsel %vm46_vm12, %v168_v49, %v144_v31  ;;  %v445_v31 = vshra.s32 %v759_v9, 1 }
  0x3f   :  { %v171_v56 = vsel %vm45_vm13, 0, %v169_v53 }
  0x40   :  { %vm147_vm10 = vcmp.lt.s32.totalorder %v146_v33, 0  ;;  %v148_v34 = vsub.s32 0, %v146_v33  ;;  %v750_v62 = vand.u32 3, %v171_v56  ;;  %v342_v63 = vadd.s32 3, %v171_v56 }
  0x42   :  { %v149_v35 = vsel %vm147_vm10, %v148_v34, %v146_v33  ;;  %v761_v13 = vand.u32 3, %v342_v63  ;;  %vm190_vm14 = vcmp.eq.s32.totalorder %v750_v62, 0  ;;  %vm189_vm15 = vcmp.lt.s32.totalorder %v750_v62, 2 }
  0x43   :  { %v150_v36 = vclz %v149_v35  ;;  %vm193_vm1 = vcmp.eq.s32.totalorder %v750_v62, 2  ;;  %v477_v34 = vand.u32 1, %v745_v57  ;;  %v358_v35 = vshra.s32 %v739_v51, 4 }
  0x44   :  { %vm344_vm2 = vcmp.lt.s32.totalorder %v761_v13, 2  ;;  %vm345_vm3 = vcmp.eq.s32.totalorder %v761_v13, 0  ;;  %vm348_vm4 = vcmp.eq.s32.totalorder %v761_v13, 2 }
  0x45   :  { %v563_v37 = vadd.s32 4294967294, %v150_v36  ;;  %v796_v36 = vand.u32 1, %v446_v23 }
  0x47   :  { %vm564_vm11 = vcmp.lt.s32.totalorder %v563_v37, 0 }
  0x48   :  { %v153_v38 = vsel %vm564_vm11, 0, %v563_v37  ;;  %v363_v37 = vand.u32 1, %v359_v24 }
  0x49   :  { %v154_v39 = vsub.s32 32, %v153_v38  ;;  %v155_v40 = vshll.u32 %v146_v33, %v153_v38  ;;  %v158_v41 = vsub.s32 4294967266, %v153_v38  ;;  %v800_v38 = vand.u32 1, %v415_v26 }
  0x4a   :  { %vm367_vm11 = vcmp.eq.s32.totalorder %v363_v37, 0 }
  0x4b   :  { %v156_v29 = vshrl.u32 %v138_v11, %v154_v39  ;;  %v159_v42 = vadd.s32 127, %v158_v41  ;;  %v798_v11 = vand.u32 1, %v385_v25  ;;  %v476_v41 = vand.u32 1, %v748_v58 }
  0x4c   :  { %vm423_vm9 = vcmp.eq.s32.totalorder %v800_v38, 0 }
  0x4d   :  { %v157_v43 = vor.u32 %v156_v29, %v155_v40  ;;  %v160_v44 = vshll.u32 %v159_v42, 23  ;;  %v806_v29 = vand.u32 1, %v445_v31  ;;  %v475_v42 = vand.u32 1, %v759_v9 }
  0x4e   :  { %vm393_vm10 = vcmp.eq.s32.totalorder %v798_v11, 0 }
  0x4f   :  { %v161_v45 = vor.u32 4788187, %v160_v44  ;;  %v164_v46 = vcvt.s32.f32 %v157_v43  ;;  %v384_v43 = vshra.s32 %v739_v51, 3  ;;  %v414_v44 = vshra.s32 %v739_v51, 2 }
  0x51   :  { %v162_v48 = vand.u32 2147483647, %v161_v45  ;;  %v444_v45 = vshra.s32 %v739_v51, 1  ;;  %v388_v58 = vand.u32 1, %v384_v43 }
  0x53   :  { %v165_v50 = vmul.f32 %v164_v46, %v162_v48 }
  0x55   :  { %v166_v52 = vxor.u32 2147483648, %v165_v50 }
  0x57   :  { %v167_v54 = vsel %vm46_vm12, %v166_v52, %v165_v50  ;;  %vm816_vm12 = vcmp.eq.s32.totalorder %v477_v34, 0  ;;  %v362_v50 = vand.u32 1, %v358_v35 }
  0x58   :  { %v170_v55 = vsel %vm45_vm13, %v697_v1, %v167_v54  ;;  %vm454_vm13 = vcmp.eq.s32.totalorder %v796_v36, 0 }
  0x59   :  { %v172_v59 = vmul.f32 %v170_v55, %v170_v55 }
  0x5b   :  { %v173_v60 = vmul.f32 -0.001358992, %v172_v59  ;;  %v180_v61 = vmul.f32 -0.00019511016, %v172_v59 }
  0x5d   :  { %v174_v5 = vadd.f32 0.041655596, %v173_v60  ;;  %v181_v6 = vadd.f32 0.008332121, %v180_v61 }
  0x5f   :  { %v175_v10 = vmul.f32 %v174_v5, %v172_v59  ;;  %v182_v12 = vmul.f32 %v181_v6, %v172_v59 }
  0x61   :  { %v176_v19 = vadd.f32 -0.4999988, %v175_v10  ;;  %v183_v20 = vadd.f32 -0.16666654, %v182_v12 }
  0x63   :  { %v177_v27 = vmul.f32 %v176_v19, %v172_v59  ;;  %v184_v28 = vmul.f32 %v183_v20, %v172_v59  ;;  %v418_v59 = vand.u32 1, %v414_v44 }
  0x65   :  { %v178_v32 = vadd.f32 1.0, %v177_v27  ;;  %v185_v33 = vadd.f32 1.0, %v184_v28 }
  0x67   :  { %v186_v39 = vmul.f32 %v185_v33, %v170_v55  ;;  %v194_v40 = vxor.u32 2147483648, %v178_v32  ;;  %v474_v55 = vand.u32 1, %v739_v51  ;;  %v448_v51 = vand.u32 1, %v444_v45 }
  0x69   :  { %v191_v46 = vxor.u32 2147483648, %v186_v39  ;;  %v195_v47 = vsel %vm193_vm1, %v194_v40, %v186_v39  ;;  %v350_v48 = vsel %vm348_vm4, %v194_v40, %v186_v39  ;;  %vm827_vm1 = vcmp.eq.s32.totalorder %v476_v41, 0 }
  0x6a   :  { %vm899_vm4 = vcmp.eq.s32.totalorder %v776_v22, 0 }
  0x6b   :  { %v192_v52 = vsel %vm190_vm14, %v178_v32, %v191_v46  ;;  %v347_v53 = vsel %vm345_vm3, %v178_v32, %v191_v46  ;;  %vm841_vm14 = vcmp.eq.s32.totalorder %v475_v42, 0  ;;  %vm452_vm3 = vcmp.eq.s32.totalorder %v448_v51, 0  ;;  %v500_v46 = vld [vmem:[#allocation5] sm:$0xff] }
  0x6c   :  { %v196_v56 = vsel %vm189_vm15, %v192_v52, %v195_v47  ;;  %v351_v57 = vsel %vm344_vm2, %v347_v53, %v350_v48  ;;  %vm845_vm15 = vcmp.eq.s32.totalorder %v474_v55, 0  ;;  %vm898_vm2 = vcmp.eq.s32.totalorder %v774_v21, 0  ;;  %v501_v47 = vld [vmem:[#allocation5 + $0x8] sm:$0xff] }
  0x6d   :  { %v197_v60 = vsel %vm187_vm0, nan, %v196_v56  ;;  %v352_v61 = vsel %vm187_vm0, nan, %v351_v57  ;;  %vm392_vm0 = vcmp.eq.s32.totalorder %v388_v58, 0 }
  0x6e   :  { %v378_v4 = vperm.slane %v197_v60, 0  ;;  %v379_v62 = vperm.slane %v352_v61, 0  ;;  %v404_v0 = vperm.slane %v197_v60, 1  ;;  %v405_v2 = vperm.slane %v352_v61, 1 }
  0x6f   :  { %v434_v3 = vperm.slane %v197_v60, 2  ;;  %v435_v5 = vperm.slane %v352_v61, 2  ;;  %v464_v6 = vperm.slane %v197_v60, 3  ;;  %v465_v7 = vperm.slane %v352_v61, 3 }
  0x70   :  { %v383_v1 = vsel %vm369_vm5, %v378_v4, %v379_v62  ;;  %v409_v9 = vsel %vm395_vm6, %v404_v0, %v405_v2  ;;  %v490_v10 = vperm.slane %v197_v60, 4  ;;  %v491_v12 = vperm.slane %v352_v61, 4 }
  0x71   :  { %v413_v13 = vmul.f32 %v409_v9, %v383_v1  ;;  %v439_v14 = vsel %vm425_vm7, %v434_v3, %v435_v5  ;;  %v382_v19 = vsel %vm368_vm8, %v378_v4, %v379_v62  ;;  %v469_v20 = vsel %vm898_vm2, %v464_v6, %v465_v7 }
  0x72   :  { %v408_v15 = vsel %vm899_vm4, %v404_v0, %v405_v2  ;;  %vm900_vm5 = vcmp.eq.s32.totalorder %v783_v30, 0  ;;  %vm422_vm6 = vcmp.eq.s32.totalorder %v418_v59, 0  ;;  %v381_v25 = vsel %vm367_vm11, %v378_v4, %v379_v62 }
  0x73   :  { %v438_v16 = vsel %vm900_vm5, %v434_v3, %v435_v5  ;;  %v443_v23 = vmul.f32 %v439_v14, %v413_v13  ;;  %v412_v24 = vmul.f32 %v408_v15, %v382_v19  ;;  %v495_v17 = vsel %vm816_vm12, %v490_v10, %v491_v12 }
  0x74   :  { %v468_v18 = vsel %vm454_vm13, %v464_v6, %v465_v7  ;;  %v407_v21 = vsel %vm393_vm10, %v404_v0, %v405_v2  ;;  %v437_v22 = vsel %vm423_vm9, %v434_v3, %v435_v5  ;;  %vm901_vm7 = vcmp.eq.s32.totalorder %v362_v50, 0 }
  0x75   :  { %v473_v26 = vmul.f32 %v469_v20, %v443_v23  ;;  %v442_v27 = vmul.f32 %v438_v16, %v412_v24  ;;  %v411_v28 = vmul.f32 %v407_v21, %v381_v25  ;;  %v380_v30 = vsel %vm901_vm7, %v378_v4, %v379_v62 }
  0x76   :  { %v494_v31 = vsel %vm827_vm1, %v490_v10, %v491_v12  ;;  %vm902_vm8 = vcmp.eq.s32.totalorder %v806_v29, 0  ;;  %v406_v33 = vsel %vm392_vm0, %v404_v0, %v405_v2  ;;  %v436_v34 = vsel %vm422_vm6, %v434_v3, %v435_v5 }
  0x77   :  { %v467_v32 = vsel %vm902_vm8, %v464_v6, %v465_v7  ;;  %v499_v35 = vmul.f32 %v495_v17, %v473_v26  ;;  %v472_v36 = vmul.f32 %v468_v18, %v442_v27  ;;  %v441_v37 = vmul.f32 %v437_v22, %v411_v28 }
  0x78   :  { %v410_v11 = vmul.f32 %v406_v33, %v380_v30  ;;  %v493_v38 = vsel %vm841_vm14, %v490_v10, %v491_v12  ;;  %v466_v39 = vsel %vm452_vm3, %v464_v6, %v465_v7  ;;  %v492_v29 = vsel %vm845_vm15, %v490_v10, %v491_v12 }
  0x79   :  { %521 = vmatpush.msra.mxu0 %v499_v35  ;;  %570 = vmatpush.msra.mxu1 %v499_v35  ;;  %v498_v40 = vmul.f32 %v494_v31, %v472_v36  ;;  %v471_v41 = vmul.f32 %v467_v32, %v441_v37  ;;  %vm502_vm9 = vcmask 261120  }
  0x7a   :  { %v440_v42 = vmul.f32 %v436_v34, %v410_v11 }
  0x7b   :  { %522 = vmatpush.msra.mxu0 %v498_v40  ;;  %571 = vmatpush.msra.mxu1 %v498_v40  ;;  %v497_v43 = vmul.f32 %v493_v38, %v471_v41 }
  0x7c   :  { %v470_v44 = vmul.f32 %v466_v39, %v440_v42 }
  0x7d   :  { %523 = vmatpush.msra.mxu0 %v497_v43  ;;  %572 = vmatpush.msra.mxu1 %v497_v43 }
  0x7e   :  { %v496_v45 = vmul.f32 %v492_v29, %v470_v44 }
  0x80   :  { %524 = vmatpush.msra.mxu0 %v496_v45  ;;  %573 = vmatpush.msra.mxu1 %v496_v45 }
  0x81   :  { %568 = vmatmul.msk.f32.vlgmr.msra.gmra.mxu0 %vm502_vm9, %v500_v46  ;;  %569 = vmatmul.msk.f32.vlgmr.msra.gmra.mxu1 %vm502_vm9, %v501_v47 }
  0xfe   :  { %v526_v48 = vpop.f32.mrf.mxu0  ;;  %v529_v49 = vpop.f32.mrf.mxu1 }
  0xff   :  { %v532_v50 = vmul.f32 %v526_v48, %v526_v48  ;;  %v533_v52 = vmul.f32 %v529_v49, %v529_v49 }
 0x101   :  { %v534_v53 = vadd.f32 %v533_v52, %v532_v50 }
 0x103   :  { %v535_v54 = vrot.slane %v534_v53, 4 }
 0x105   :  { %v536_v55 = vadd.f32 %v535_v54, %v534_v53 }
 0x107   :  { %v537_v56 = vrot.slane %v536_v55, 2 }
 0x109   :  { %v538_v57 = vadd.f32 %v537_v56, %v536_v55 }
 0x10b   :  { %v539_v58 = vrot.slane %v538_v57, 1 }
 0x10d   :  { %v540_v59 = vadd.f32 %v539_v58, %v538_v57 }
 0x10f   :  { %v541_v60 = vsub.f32 1.0, %v540_v59 }
 0x111   :  { %v542_v61 = vmul.f32 0.5, %v541_v60 }
 0x113   :  { %543 = vst [vmem:[#allocation7] sm:$0x1] %v542_v61 }
 0x114   :  { %554 = dma.vmem_to_hbm [thread:$0]  %s550_s1, 16, %s552_s23, [#allocation4]  }
 0x115   :  { %662 = dma.done.wait [#allocation4], 16  }
 0x116   :  { %663 = vsyncadd [#allocation4], 4294967280 }
 0x117   :  { %559 = vsyncpa [#allocation3], 1 }
 0x118   :  { %560 = vsyncpa [#allocation6], 1 }
 0x119   :  { %561 = vsyncpa [#allocation4], 1 }

</bundles_post_ra>
